<compile_context>
chip_gen: v7x
topology: tpu7x:2x2x1
jax: 0.10.0
libtpu: 0.0.40
codegen_flags: <defaults>
</compile_context>

<pallas_src>
import jax
import jax.numpy as jnp
from jax.experimental import pallas as pl
from jax.experimental.pallas import tpu as pltpu


def _mlp_kernel(x_ref, w_ref, b_ref, o_ref):
    # x_ref: (TB, F) VMEM tile of the batch (streamed / double-buffered)
    # w_ref: (1, F)  VMEM, resident across all grid steps
    # b_ref: (1,)    SMEM scalar bias
    # o_ref: (TB, 1) output tile
    x = x_ref[...].astype(jnp.float32)                   # (TB, F)
    w = w_ref[...].astype(jnp.float32)                   # (1, F) broadcast over rows
    b = b_ref[0]                                          # scalar from SMEM
    # VPU elementwise multiply + XLU lane reduction; f32 accumulation.
    acc = jnp.sum(x * w, axis=-1, keepdims=True)          # (TB, 1)
    o_ref[...] = (acc + b).astype(o_ref.dtype)


def _choose_batch_tile(B, F):
    """Batch tile: multiple of 8 (sublane granule), capped so a double-buffered
    (tb, F) f32 tile pair stays under ~8 MiB (safe on every TPU generation)."""
    bytes_per_row = max(1, F) * 4
    max_rows_by_vmem = max(8, (8 * 1024 * 1024) // (2 * bytes_per_row))
    tb = min(512, max_rows_by_vmem)
    tb = max(8, (tb // 8) * 8)
    b_ceil8 = ((B + 7) // 8) * 8
    return min(tb, b_ceil8)


def one_layer_mlp(x, weight, bias):
    """Forward pass of One_Layer_MLP.

    x:      (..., F) float32
    weight: (1, F)   float32 (torch.nn.Linear layout: out_features x in_features)
    bias:   (1,)     float32
    returns (..., 1) float32
    """
    lead_shape = x.shape[:-1]
    F = x.shape[-1]
    x2 = x.reshape(-1, F)
    B = x2.shape[0]

    tb = _choose_batch_tile(B, F)
    n_tiles = pl.cdiv(B, tb)

    bias_smem = bias.reshape(1).astype(jnp.float32)

    cost = pl.CostEstimate(
        flops=2 * B * F,
        transcendentals=0,
        bytes_accessed=4 * (B * F + F + 1 + B),
    )

    out = pl.pallas_call(
        _mlp_kernel,
        out_shape=jax.ShapeDtypeStruct((B, 1), x2.dtype),
        grid_spec=pltpu.PrefetchScalarGridSpec(
            num_scalar_prefetch=0,
            grid=(n_tiles,),
            in_specs=[
                # Batch tile: streamed + double-buffered across grid steps.
                pl.BlockSpec((tb, F), lambda i: (i, 0)),
                # Weight row: same block every step -> resident in VMEM.
                pl.BlockSpec((1, F), lambda i: (0, 0)),
                # Bias: SMEM scalar (no padded (8,128) VMEM tile).
                pl.BlockSpec(memory_space=pltpu.MemorySpace.SMEM),
            ],
            out_specs=pl.BlockSpec((tb, 1), lambda i: (i, 0)),
        ),
        compiler_params=pltpu.CompilerParams(
            dimension_semantics=("parallel",),  # shard batch tiles across TCs
        ),
        cost_estimate=cost,
    )(x2, weight, bias_smem)

    return out.reshape(lead_shape + (1,))


def _reference(x, weight, bias):
    return x @ weight.T + bias[None, :]


if __name__ == "__main__":
    key = jax.random.PRNGKey(0)
    kx, kw, kb = jax.random.split(key, 3)

    batch = 8
    n_input_units = 32

    # Deterministic parameter init mimicking torch.nn.Linear's uniform init.
    bound = 1.0 / (n_input_units ** 0.5)
    weight = jax.random.uniform(
        kw, (1, n_input_units), jnp.float32, minval=-bound, maxval=bound
    )
    bias = jax.random.uniform(
        kb, (1,), jnp.float32, minval=-bound, maxval=bound
    )

    x = jax.random.normal(kx, (batch, n_input_units), jnp.float32)

    out = jax.block_until_ready(one_layer_mlp(x, weight, bias))
    ref = _reference(x, weight, bias)
    assert out.shape == (batch, 1), out.shape
    assert jnp.allclose(out, ref, atol=1e-5, rtol=1e-5), "mismatch vs reference"

    # Also exercise a ragged batch (not a multiple of 8 / of the tile size).
    x2 = jax.random.normal(kx, (13, n_input_units), jnp.float32)
    out2 = jax.block_until_ready(one_layer_mlp(x2, weight, bias))
    ref2 = _reference(x2, weight, bias)
    assert out2.shape == (13, 1), out2.shape
    assert jnp.allclose(out2, ref2, atol=1e-5, rtol=1e-5), "mismatch (ragged batch)"

    print("KERNEL_OK")
</pallas_src>

<mosaic_0001>
module attributes {stable_mosaic.version = 11 : i64} {
  func.func @_mlp_kernel(%arg0: i32, %arg1: memref<8x32xf32, #tpu.memory_space<vmem>>, %arg2: memref<1x32xf32, #tpu.memory_space<vmem>>, %arg3: memref<1xf32, #tpu.memory_space<smem>>, %arg4: memref<8x1xf32, #tpu.memory_space<vmem>>) attributes {dimension_semantics = [#tpu.dimension_semantics<parallel>], iteration_bounds = array<i64: 1>, scalar_prefetch = 0 : i64, scratch_operands = 0 : i64, tpu.core_type = #tpu.core_type<tc>, window_params = [{transform_indices = @transform_0, window_bounds = array<i64: 8, 32>}, {pipeline_mode = #tpu.pipeline_mode<synchronous>, transform_indices = @transform_1, window_bounds = array<i64: 1, 32>}, {transform_indices = @transform_2, window_bounds = array<i64: 1>}, {transform_indices = @transform_3, window_bounds = array<i64: 8, 1>}]} {
    %c0 = arith.constant 0 : index
    %c0_0 = arith.constant 0 : index
    %0 = vector.load %arg1[%c0, %c0_0] : memref<8x32xf32, #tpu.memory_space<vmem>>, vector<8x32xf32>
    %c0_1 = arith.constant 0 : index
    %c0_2 = arith.constant 0 : index
    %1 = vector.load %arg2[%c0_1, %c0_2] : memref<1x32xf32, #tpu.memory_space<vmem>>, vector<1x32xf32>
    %c0_3 = arith.constant 0 : index
    %2 = memref.load %arg3[%c0_3] : memref<1xf32, #tpu.memory_space<smem>>
    %3 = vector.broadcast %1 : vector<1x32xf32> to vector<8x32xf32>
    %4 = arith.mulf %0, %3 : vector<8x32xf32>
    %cst = arith.constant dense<0.000000e+00> : vector<8xf32>
    %5 = vector.multi_reduction <add>, %4, %cst [1] : vector<8x32xf32> to vector<8xf32>
    %6 = vector.shape_cast %5 : vector<8xf32> to vector<8x1xf32>
    %7 = vector.broadcast %2 : f32 to vector<8x1xf32>
    %8 = arith.addf %6, %7 : vector<8x1xf32>
    %c0_4 = arith.constant 0 : index
    %c0_5 = arith.constant 0 : index
    %9 = vector.load %arg4[%c0_4, %c0_5] : memref<8x1xf32, #tpu.memory_space<vmem>>, vector<8x1xf32>
    tpu.vector_store %arg4[%c0_4, %c0_5], %8 {strides = array<i32>} : memref<8x1xf32, #tpu.memory_space<vmem>>, vector<8x1xf32>,
    return
  }
  func.func @transform_0(%arg0: i32) -> (i32, i32) {
    %c0_i32 = arith.constant 0 : i32
    %c0_i32_0 = arith.constant 0 : i32
    return %arg0, %c0_i32 : i32, i32
  }
  func.func @transform_1(%arg0: i32) -> (i32, i32) {
    %c0_i32 = arith.constant 0 : i32
    %c0_i32_0 = arith.constant 0 : i32
    %c0_i32_1 = arith.constant 0 : i32
    return %c0_i32, %c0_i32_0 : i32, i32
  }
  func.func @transform_2(%arg0: i32) -> i32 {
    %c0_i32 = arith.constant 0 : i32
    %c0_i32_0 = arith.constant 0 : i32
    return %c0_i32 : i32
  }
  func.func @transform_3(%arg0: i32) -> (i32, i32) {
    %c0_i32 = arith.constant 0 : i32
    %c0_i32_0 = arith.constant 0 : i32
    return %arg0, %c0_i32 : i32, i32
  }
}

</mosaic_0001>

<bundles_post_ra>
// kernel: tpu_custom_call.1
= control target key start
LH: loop header
LB: loop body
LE: loop exit
PB: predicated region body
PF: predicated region fallthrough
CT: control target
= control target key end

     0   :  { %9 = vsyncpa [#allocation4], 0  ;;  %s76_s12 = smov [#allocation3]   ;;  %s118_s0 = inlined_call_operand.hbm [shape: f32[8,32], index: 0, kind: input, shape index: {}]   ;;  %s119_s1 = inlined_call_operand.vmem [shape: f32[1,32], index: 1, kind: input, shape index: {}]   ;;  %s120_s2 = inlined_call_operand.<no memory space> [shape: f32[1], index: 2, kind: input, shape index: {}]   ;;  %s121_s3 = inlined_call_operand.vmem [shape: f32[8,1], index: 3, kind: output, shape index: {}]  }
   0x1   :  { %s16_s13 = sshll.u32 %s76_s12, 4  ;;  %s52_s16 = scalar_lea.hbm %s118_s0, 128  ;;  %s17_s13 = int_to_ptr.vmem [resolvable:$true] %s16_s13 }
   0x2   :  { %p53_p0 = scmp.ne.s32.totalorder %s118_s0, %s52_s16  ;;  %p56_p1 = scmp.lt.u32.totalorder %s52_s16, %s118_s0 }
   0x4   :  { %p58_p2 = pnand %p56_p1, %p53_p0 }
   0x6   :  { %61 = shalt.err (!%p58_p2)
}
   0x7   :  { %s62_s21 = scalar_lea.vmem %s17_s13, 128  ;;  %p67_p4 = scmp.lt.s32.totalorder %s17_s13, %s17_s13 }
   0x8   :  { %p63_p3 = scmp.ne.s32.totalorder %s17_s13, %s62_s21  ;;  %p68_p5 = scmp.lt.s32.totalorder %s62_s21, %s62_s21 }
   0xa   :  { %p69_p6 = por %p68_p5, %p67_p4 }
   0xc   :  { %p70_p7 = pnand %p69_p6, %p63_p3 }
   0xe   :  { %73 = shalt.err (!%p70_p7)
}
   0xf   :  { %19 = dma.hbm_to_vmem [thread:$0]  %s118_s0, 128, %s17_s13, [#allocation4]  }
  0x10   :  { %74 = dma.done.wait [#allocation4], 128  }
  0x11   :  { %75 = vsyncadd [#allocation4], 4294967168  ;;  %v27_v0 = vld [vmem:[#allocation3] sm:$0xff]  ;;  %vm37_vm0 = vcmask 261120   ;;  %v41_v4 = vstv %s120_s2  ;;  %vm43_vm1 = vcmask 7168  }
  0x12   :  { %v50_v1 = vld [vmem:[%s119_s1] ss:$0 sm:$0xff] }
  0x13   :  { %v36_v2 = vmul.f32 %v50_v1, %v27_v0 }
  0x15   :  { %v38_v3 = vsel %vm37_vm0, %v36_v2, 0.0 }
  0x16   :  { %39 = vadd.xlane.f32.xlu0 %v38_v3 }
  0xa3   :  { %v40_v5 = vpop.xlane.xlu0 %39 }
  0xa4   :  { %v42_v6 = vadd.f32 %v41_v4, %v40_v5 }
  0xa6   :  { %44 = vst.msk [vmem:[%s121_s3] sm:$0xff] %vm43_vm1, %v42_v6 }
  0xa7   :  { %49 = vsyncpa [#allocation4], 1 }

</bundles_post_ra>
